<compile_context>
chip_gen: v7x
topology: tpu7x:2x2x1
jax: 0.10.0
libtpu: 0.0.40
codegen_flags: <defaults>
</compile_context>

<pallas_src>
import jax
import jax.numpy as jnp
from jax.experimental import pallas as pl
from jax.experimental.pallas import tpu as pltpu

_LANE = 128
_BLOCK_BYTES_BUDGET = 16 * 1024 * 1024  # budget for double-buffered in+out blocks


def _nconv_kernel(at_ref, x_ref, o_ref):
    # at_ref: (W, V)     pre-transposed A, VMEM-resident across the grid
    # x_ref : (V, TILE)  lane-dense slab of x
    # o_ref : (W, TILE)  lane-dense output slab (full unmasked 128-lane stores)
    o_ref[...] = jnp.dot(
        at_ref[...], x_ref[...], preferred_element_type=jnp.float32
    ).astype(o_ref.dtype)


def _round_up(x, m):
    return ((x + m - 1) // m) * m


def _pick_tile(total_lanes, v, w, itemsize, n_outer):
    """Lane-tile size from a VMEM budget; keep >=2 grid steps when possible."""
    per_lane = 2 * (v + w) * itemsize            # double-buffered x + out blocks
    tile = _BLOCK_BYTES_BUDGET // max(per_lane, 1)
    tile = max(_LANE, (tile // _LANE) * _LANE)   # multiple of 128 lanes
    rounded = _round_up(total_lanes, _LANE)
    tile = min(tile, rounded)
    # keep at least 2 grid steps so v7x's two TensorCores both get work
    if n_outer <= 1 and tile >= rounded and rounded >= 2 * _LANE:
        tile = max(_LANE, ((rounded // 2) // _LANE) * _LANE)
    return tile


def _compiler_params(vmem_need_bytes, n_grid_axes):
    # explicit scoped-VMEM limit: v5e default is only ~16 MiB, v7x physical is 64 MiB
    vmem_limit = int(min(max(vmem_need_bytes + (8 << 20), 24 << 20), 64 << 20))
    return pltpu.CompilerParams(
        dimension_semantics=("parallel",) * n_grid_axes,
        vmem_limit_bytes=vmem_limit,
    )


def nconv(x, A):
    """x: (n, c, v, l), A: (v, w) -> (n, c, w, l) == einsum('ncvl,vw->ncwl')."""
    n, c, v, l = x.shape
    v2, w = A.shape
    assert v == v2, "contraction dims must match"

    b = n * c
    itemsize = jnp.dtype(x.dtype).itemsize
    a_t = A.T  # (w, v); hoisted once (tiny), stays VMEM-resident in the kernel

    flops = 2 * b * l * v * w
    bytes_accessed = (b * v * l + b * w * l + v * w) * itemsize
    cost = pl.CostEstimate(
        flops=flops, transcendentals=0, bytes_accessed=bytes_accessed
    )

    if l >= _LANE:
        # ------- fast path: natural (b, v, l) layout, zero wrapper relayout ----
        x3 = x.reshape(b, v, l)  # free reshape (n, c adjacent)
        tile_l = _pick_tile(l, v, w, itemsize, n_outer=b)
        grid = (b, pl.cdiv(l, tile_l))
        vmem_need = (2 * (v + w) * tile_l + 2 * w * v) * itemsize

        out = pl.pallas_call(
            _nconv_kernel,
            out_shape=jax.ShapeDtypeStruct((b, w, l), x.dtype),
            grid_spec=pltpu.PrefetchScalarGridSpec(
                num_scalar_prefetch=0,
                grid=grid,
                in_specs=[
                    # A^T: constant index_map -> fetched once, stays resident.
                    pl.BlockSpec((w, v), lambda i, j: (0, 0)),
                    # x: one batch row, full V, lane-dense TILE_L columns.
                    pl.BlockSpec((None, v, tile_l), lambda i, j: (i, 0, j)),
                ],
                out_specs=pl.BlockSpec((None, w, tile_l), lambda i, j: (i, 0, j)),
            ),
            compiler_params=_compiler_params(vmem_need, 2),
            cost_estimate=cost,
        )(a_t, x3)
        return out.reshape(n, c, w, l)

    # ------- small-l fallback: fuse N = b*l into the lane dimension -----------
    N = b * l
    x_t = jnp.transpose(x.reshape(b, v, l), (1, 0, 2)).reshape(v, N)  # (V, B*L)
    tile_n = _pick_tile(N, v, w, itemsize, n_outer=1)
    grid = (pl.cdiv(N, tile_n),)
    vmem_need = (2 * (v + w) * tile_n + 2 * w * v) * itemsize

    out = pl.pallas_call(
        _nconv_kernel,
        out_shape=jax.ShapeDtypeStruct((w, N), x.dtype),
        grid_spec=pltpu.PrefetchScalarGridSpec(
            num_scalar_prefetch=0,
            grid=grid,
            in_specs=[
                pl.BlockSpec((w, v), lambda i: (0, 0)),
                pl.BlockSpec((v, tile_n), lambda i: (0, i)),
            ],
            out_specs=pl.BlockSpec((w, tile_n), lambda i: (0, i)),
        ),
        compiler_params=_compiler_params(vmem_need, 1),
        cost_estimate=cost,
    )(a_t, x_t)

    out = jnp.transpose(out.reshape(w, b, l), (1, 0, 2))  # (B, W, L)
    return out.reshape(n, c, w, l)


if __name__ == "__main__":
    key = jax.random.PRNGKey(0)
    kx, ka = jax.random.split(key)

    n, c, v, l = 2, 4, 16, 16
    w = 16

    # small-l case -> fused-N fallback path
    x = jax.random.normal(kx, (n, c, v, l), dtype=jnp.float32)
    A = jax.random.normal(ka, (v, w), dtype=jnp.float32)
    out = jax.block_until_ready(nconv(x, A))
    ref = jnp.einsum("ncvl,vw->ncwl", x, A)
    assert out.shape == (n, c, w, l), out.shape
    assert jnp.allclose(out, ref, atol=1e-4, rtol=1e-4), "mismatch (small-l path)"

    # lane-aligned case -> natural-layout fast path (no relayout)
    l2 = 128
    x2 = jax.random.normal(kx, (n, c, v, l2), dtype=jnp.float32)
    out2 = jax.block_until_ready(nconv(x2, A))
    ref2 = jnp.einsum("ncvl,vw->ncwl", x2, A)
    assert out2.shape == (n, c, w, l2), out2.shape
    assert jnp.allclose(out2, ref2, atol=1e-4, rtol=1e-4), "mismatch (fast path)"

    print("KERNEL_OK")
</pallas_src>

<mosaic_0001>
module attributes {stable_mosaic.version = 11 : i64} {
  func.func @_nconv_kernel(%arg0: i32, %arg1: memref<16x16xf32, #tpu.memory_space<vmem>>, %arg2: memref<16x128xf32, #tpu.memory_space<vmem>>, %arg3: memref<16x128xf32, #tpu.memory_space<vmem>>) attributes {dimension_semantics = [#tpu.dimension_semantics<parallel>], iteration_bounds = array<i64: 1>, scalar_prefetch = 0 : i64, scratch_operands = 0 : i64, tpu.core_type = #tpu.core_type<tc>, window_params = [{pipeline_mode = #tpu.pipeline_mode<synchronous>, transform_indices = @transform_0, window_bounds = array<i64: 16, 16>}, {transform_indices = @transform_1, window_bounds = array<i64: 16, 128>}, {transform_indices = @transform_2, window_bounds = array<i64: 16, 128>}]} {
    %c0 = arith.constant 0 : index
    %c0_0 = arith.constant 0 : index
    %0 = vector.load %arg1[%c0, %c0_0] : memref<16x16xf32, #tpu.memory_space<vmem>>, vector<16x16xf32>
    %c0_1 = arith.constant 0 : index
    %c0_2 = arith.constant 0 : index
    %1 = vector.load %arg2[%c0_1, %c0_2] : memref<16x128xf32, #tpu.memory_space<vmem>>, vector<16x128xf32>
    %cst = arith.constant dense<0.000000e+00> : vector<16x128xf32>
    %2 = tpu.matmul %0, %1, %cst {dimension_numbers = #tpu.dot_dimension_numbers<[1], [0], [0], [1], [0, 0, 1, 1], [], []>} : vector<16x16xf32>, vector<16x128xf32>, vector<16x128xf32> -> vector<16x128xf32>
    %c0_3 = arith.constant 0 : index
    %c0_4 = arith.constant 0 : index
    %3 = vector.load %arg3[%c0_3, %c0_4] : memref<16x128xf32, #tpu.memory_space<vmem>>, vector<16x128xf32>
    tpu.vector_store %arg3[%c0_3, %c0_4], %2 {strides = array<i32>} : memref<16x128xf32, #tpu.memory_space<vmem>>, vector<16x128xf32>,
    return
  }
  func.func @transform_0(%arg0: i32) -> (i32, i32) {
    %c0_i32 = arith.constant 0 : i32
    %c0_i32_0 = arith.constant 0 : i32
    %c0_i32_1 = arith.constant 0 : i32
    return %c0_i32, %c0_i32_0 : i32, i32
  }
  func.func @transform_1(%arg0: i32) -> (i32, i32) {
    %c0_i32 = arith.constant 0 : i32
    %c0_i32_0 = arith.constant 0 : i32
    return %c0_i32, %arg0 : i32, i32
  }
  func.func @transform_2(%arg0: i32) -> (i32, i32) {
    %c0_i32 = arith.constant 0 : i32
    %c0_i32_0 = arith.constant 0 : i32
    return %c0_i32, %arg0 : i32, i32
  }
}

</mosaic_0001>

<bundles_post_ra>
// kernel: tpu_custom_call.1
= control target key start
LH: loop header
LB: loop body
LE: loop exit
PB: predicated region body
PF: predicated region fallthrough
CT: control target
= control target key end

     0   :  { %7 = vsyncpa [#allocation3], 0  ;;  %s305_s0 = inlined_call_operand.hbm [shape: f32[16,16], index: 0, kind: input, shape index: {}]   ;;  %s306_s1 = inlined_call_operand.hbm [shape: f32[16,128], index: 1, kind: input, shape index: {}]   ;;  %s307_s2 = inlined_call_operand.hbm [shape: f32[16,128], index: 2, kind: output, shape index: {}]  }
   0x1   :  { %8 = vsyncpa [#allocation6], 0 }
   0x2   :  { %9 = vsyncpa [#allocation4], 0  ;;  %s240_s9 = smov [#allocation2]   ;;  %s168_s13 = scalar_lea.hbm %s305_s0, 256 }
   0x3   :  { %s15_s10 = sshll.u32 %s240_s9, 4  ;;  %p169_p0 = scmp.ne.s32.totalorder %s305_s0, %s168_s13  ;;  %s16_s10 = int_to_ptr.vmem [resolvable:$true] %s15_s10 }
   0x4   :  { %p172_p1 = scmp.lt.u32.totalorder %s168_s13, %s305_s0 }
   0x6   :  { %p174_p2 = pnand %p172_p1, %p169_p0 }
   0x8   :  { %177 = shalt.err (!%p174_p2)
}
   0x9   :  { %s178_s18 = scalar_lea.vmem %s16_s10, 256  ;;  %p183_p4 = scmp.lt.s32.totalorder %s16_s10, %s16_s10 }
   0xa   :  { %p179_p3 = scmp.ne.s32.totalorder %s16_s10, %s178_s18  ;;  %p184_p5 = scmp.lt.s32.totalorder %s178_s18, %s178_s18 }
   0xc   :  { %p185_p6 = por %p184_p5, %p183_p4 }
   0xe   :  { %p186_p7 = pnand %p185_p6, %p179_p3 }
  0x10   :  { %189 = shalt.err (!%p186_p7)
}
  0x11   :  { %s241_s19 = smov 128   ;;  %s242_s20 = smov 8  }
  0x12   :  { %21 = dma.hbm_to_vmem [thread:$0]  %s305_s0, 256, %s16_s10, [#allocation3], %s241_s19, %s241_s19, %s242_s20  }
  0x13   :  { %s243_s23 = smov [#allocation5]   ;;  %s190_s27 = scalar_lea.hbm %s306_s1, 256 }
  0x14   :  { %s27_s24 = sshll.u32 %s243_s23, 4  ;;  %p191_p8 = scmp.ne.s32.totalorder %s306_s1, %s190_s27  ;;  %s28_s24 = int_to_ptr.vmem [resolvable:$true] %s27_s24 }
  0x15   :  { %p194_p9 = scmp.lt.u32.totalorder %s190_s27, %s306_s1 }
  0x17   :  { %p196_p10 = pnand %p194_p9, %p191_p8 }
  0x19   :  { %199 = shalt.err (!%p196_p10)
}
  0x1a   :  { %s200_s4 = scalar_lea.vmem %s28_s24, 256  ;;  %p205_p12 = scmp.lt.s32.totalorder %s28_s24, %s28_s24 }
  0x1b   :  { %p201_p11 = scmp.ne.s32.totalorder %s28_s24, %s200_s4  ;;  %p206_p13 = scmp.lt.s32.totalorder %s200_s4, %s200_s4 }
  0x1d   :  { %p207_p0 = por %p206_p13, %p205_p12 }
  0x1f   :  { %p208_p1 = pnand %p207_p0, %p201_p11 }
  0x21   :  { %211 = shalt.err (!%p208_p1)
}
  0x22   :  { %33 = dma.hbm_to_vmem [thread:$0]  %s306_s1, 256, %s28_s24, [#allocation6], %s241_s19, %s241_s19, %s242_s20  }
  0x23   :  { %234 = dma.done.wait [#allocation3], 256  }
  0x24   :  { %235 = vsyncadd [#allocation3], 4294967040 }
  0x25   :  { %236 = dma.done.wait [#allocation6], 256  }
  0x26   :  { %237 = vsyncadd [#allocation6], 4294967040  ;;  %vm44_vm0 = vcmask 130048   ;;  %v42_v0 = vld [vmem:[#allocation5] sm:$0xff]  ;;  %v43_v1 = vld [vmem:[#allocation5 + $0x8] sm:$0xff]  ;;  %s244_s6 = smov [#allocation7]  }
  0x27   :  { %v40_v2 = vld [vmem:[#allocation2] sm:$0xff]  ;;  %v159_v3 = vpack.c.bf16 %v43_v1, %v42_v0  ;;  %v41_v4 = vld [vmem:[#allocation2 + $0x8] sm:$0xff]  ;;  %s133_s7 = sshll.u32 %s244_s6, 4  ;;  %s134_s7 = int_to_ptr.vmem [resolvable:$true] %s133_s7 }
  0x28   :  { %156 = vmatprep.mubr.msk.f32.mxu0 %vm44_vm0, %v40_v2  ;;  %s212_s1 = scalar_lea.vmem %s134_s7, 256  ;;  %p217_p3 = scmp.lt.s32.totalorder %s134_s7, %s134_s7 }
  0x29   :  { %160 = vmatprep.subr.bf16.mxu0 %v159_v3  ;;  %p213_p2 = scmp.ne.s32.totalorder %s134_s7, %s212_s1  ;;  %p218_p4 = scmp.lt.s32.totalorder %s212_s1, %s212_s1 }
  0x2a   :  { %162 = vmatpush3.bf16.msra.mxu0 %v159_v3 }
  0x2b   :  { %p219_p5 = por %p218_p4, %p217_p3 }
  0x2d   :  { %157 = vmatmul.mubr.msk.f32.vlgmr.msra.gmra.mrb[0].mxu0 %vm44_vm0, %v41_v4  ;;  %p220_p6 = pnand %p219_p5, %p213_p2 }
 0x100   :  { %v158_v5 = vpop.f32.mrb[0].mxu0 }
 0x101   :  { %127 = vst [vmem:[#allocation7 + $0x8] sm:$0xff] %v158_v5  ;;  %v117_v6 = vpop.f32.mrb[1].mxu0 }
 0x102   :  { %126 = vst [vmem:[#allocation7] sm:$0xff] %v117_v6 }
 0x103   :  { %223 = shalt.err (!%p220_p6)
}
 0x104   :  { %s224_s10 = scalar_lea.hbm %s307_s2, 256 }
 0x105   :  { %p225_p7 = scmp.ne.s32.totalorder %s307_s2, %s224_s10  ;;  %p228_p8 = scmp.lt.u32.totalorder %s224_s10, %s307_s2 }
 0x107   :  { %p230_p9 = pnand %p228_p8, %p225_p7 }
 0x109   :  { %233 = shalt.err (!%p230_p9)
}
 0x10a   :  { %139 = dma.vmem_to_hbm [thread:$0]  %s134_s7, 256, %s307_s2, [#allocation4], %s241_s19, %s241_s19, %s242_s20  }
 0x10b   :  { %238 = dma.done.wait [#allocation4], 256  }
 0x10c   :  { %239 = vsyncadd [#allocation4], 4294967040 }
 0x10d   :  { %143 = vsyncpa [#allocation3], 1 }
 0x10e   :  { %144 = vsyncpa [#allocation6], 1 }
 0x10f   :  { %145 = vsyncpa [#allocation4], 1 }

</bundles_post_ra>
